<compile_context>
chip_gen: v7x
topology: tpu7x:2x2x1
jax: 0.10.0
libtpu: 0.0.40
codegen_flags: <defaults>
</compile_context>

<pallas_src>
import jax
import jax.numpy as jnp
from jax.experimental import pallas as pl
from jax.experimental.pallas import tpu as pltpu


def _vmem_budget_bytes():
    """Return (tile_budget_bytes, vmem_limit_bytes) sized to the running chip."""
    try:
        cap = pltpu.get_tpu_info().vmem_capacity_bytes
    except Exception:
        cap = 64 * 1024 * 1024  # conservative: v7x has 64 MiB per TensorCore
    if cap >= 96 * 1024 * 1024:                      # v5e / v6e: 128 MiB physical
        return 64 * 1024 * 1024, 96 * 1024 * 1024
    return 32 * 1024 * 1024, 48 * 1024 * 1024        # v7x: 64 MiB per TC


def _pick_row_tile(n_rows, row_bytes, itemsize, budget_bytes):
    """Largest sublane-aligned row tile under the byte budget, >=4 grid steps when possible."""
    sub = 8 if itemsize >= 4 else (16 if itemsize == 2 else 32)
    # in + out, each double-buffered by the BlockSpec pipeline -> 4 resident tiles.
    tm = max(sub, budget_bytes // (4 * row_bytes))
    # >= 4 grid steps when N allows (>= 2 steps per TensorCore on v7x so the
    # per-core double-buffer overlap stays alive; harmless on v5e/v6e).
    steps_cap = max(sub, pl.cdiv(pl.cdiv(n_rows, 4), sub) * sub)
    tm = min(tm, steps_cap)
    # never bigger than the (sublane-rounded) total row count
    tm = min(tm, pl.cdiv(n_rows, sub) * sub)
    return max(sub, (tm // sub) * sub)


def _make_norm_kernel(g, d):
    """Kernel over a (tm, g*d) tile: g original rows folded per 128-lane group."""

    def kernel(x_ref, o_ref):
        x = x_ref[...]                                      # (tm, g*d)
        if g == 1:
            mn = jnp.min(x, axis=-1, keepdims=True)         # (tm, 1)  XLU lane reduce
            mx = jnp.max(x, axis=-1, keepdims=True)
            inv = pl.reciprocal((mx - mn).astype(jnp.float32), approx=False)
            o_ref[...] = ((x - mn) * inv.astype(x.dtype)).astype(o_ref.dtype)
        else:
            tm = x.shape[0]
            xg = x.reshape(tm, g, d)                        # segmented rows
            mn = jnp.min(xg, axis=-1, keepdims=True)        # (tm, g, 1)
            mx = jnp.max(xg, axis=-1, keepdims=True)
            inv = pl.reciprocal((mx - mn).astype(jnp.float32), approx=False)
            y = (xg - mn) * inv.astype(x.dtype)
            o_ref[...] = y.reshape(tm, g * d).astype(o_ref.dtype)

    return kernel


def norm_layer(x, *, tm=None):
    """Per-row min-max normalize a 2-D array (N, D); matches NormLayer.forward."""
    N, D = x.shape
    itemsize = jnp.dtype(x.dtype).itemsize

    # Lane-dense folding: pack g = 128 // D original rows per 128-lane group.
    g = 1
    if D < 128 and 128 % D == 0:
        g_cand = 128 // D
        if g_cand > 1 and N % g_cand == 0:
            g = g_cand
    n_eff, d_eff = N // g, D * g
    x_eff = x if g == 1 else x.reshape(n_eff, d_eff)   # row-major -> free reshape

    budget, vmem_limit = _vmem_budget_bytes()
    row_bytes = d_eff * itemsize
    if tm is None:
        tm = _pick_row_tile(n_eff, row_bytes, itemsize, budget)

    # TODO(synk): for very wide rows (4 * row_bytes > budget) tile D as an inner
    # "arbitrary" grid axis with a two-pass running min/max instead of
    # over-asking VMEM here.
    vmem_limit = max(vmem_limit, 4 * tm * row_bytes + (2 << 20))

    # Ragged last block is handled by Pallas: the op is per-row, so the padded
    # rows of the final partial block never contaminate real rows and their
    # writes fall outside (N_eff, D_eff).
    grid = (pl.cdiv(n_eff, tm),)

    out = pl.pallas_call(
        _make_norm_kernel(g, D),
        out_shape=jax.ShapeDtypeStruct((n_eff, d_eff), x.dtype),
        grid_spec=pltpu.PrefetchScalarGridSpec(
            num_scalar_prefetch=0,
            grid=grid,
            in_specs=[pl.BlockSpec((tm, d_eff), lambda i: (i, 0))],
            out_specs=pl.BlockSpec((tm, d_eff), lambda i: (i, 0)),
        ),
        compiler_params=pltpu.CompilerParams(
            dimension_semantics=("parallel",),
            vmem_limit_bytes=vmem_limit,
        ),
    )(x_eff)

    return out if g == 1 else out.reshape(N, D)


if __name__ == "__main__":
    # NormLayer has no parameters; deterministic small 2-D input (batch, features).
    key = jax.random.PRNGKey(0)
    N, D = 16, 32
    x = jax.random.normal(key, (N, D), dtype=jnp.float32)

    out = jax.block_until_ready(norm_layer(x))

    # Reference in plain JAX (same math as the PyTorch module).
    mn = jnp.min(x, axis=1, keepdims=True)
    mx = jnp.max(x, axis=1, keepdims=True)
    ref = (x - mn) / (mx - mn)
    assert out.shape == ref.shape
    assert jnp.allclose(out, ref, atol=1e-5, rtol=1e-5)

    # Also exercise the non-folding (D >= 128) path with a ragged row grid.
    x2 = jax.random.normal(jax.random.PRNGKey(1), (20, 160), dtype=jnp.float32)
    out2 = jax.block_until_ready(norm_layer(x2))
    mn2 = jnp.min(x2, axis=1, keepdims=True)
    mx2 = jnp.max(x2, axis=1, keepdims=True)
    ref2 = (x2 - mn2) / (mx2 - mn2)
    assert jnp.allclose(out2, ref2, atol=1e-5, rtol=1e-5)

    print("KERNEL_OK")
</pallas_src>

<mosaic_0001>
module attributes {stable_mosaic.version = 11 : i64} {
  func.func @kernel(%arg0: i32, %arg1: memref<8x128xf32, #tpu.memory_space<vmem>>, %arg2: memref<8x128xf32, #tpu.memory_space<vmem>>) attributes {dimension_semantics = [#tpu.dimension_semantics<parallel>], iteration_bounds = array<i64: 1>, scalar_prefetch = 0 : i64, scratch_operands = 0 : i64, tpu.core_type = #tpu.core_type<tc>, window_params = [{transform_indices = @transform_0, window_bounds = array<i64: 8, 128>}, {transform_indices = @transform_1, window_bounds = array<i64: 8, 128>}]} {
    %c0 = arith.constant 0 : index
    %c0_0 = arith.constant 0 : index
    %0 = vector.load %arg1[%c0, %c0_0] : memref<8x128xf32, #tpu.memory_space<vmem>>, vector<8x128xf32>
    %1 = vector.shape_cast %0 : vector<8x128xf32> to vector<8x4x32xf32>
    %cst = arith.constant dense<0x7F800000> : vector<8x4xf32>
    %2 = vector.multi_reduction <minimumf>, %1, %cst [2] : vector<8x4x32xf32> to vector<8x4xf32>
    %3 = vector.shape_cast %2 : vector<8x4xf32> to vector<8x4x1xf32>
    %cst_1 = arith.constant dense<0xFF800000> : vector<8x4xf32>
    %4 = vector.multi_reduction <maximumf>, %1, %cst_1 [2] : vector<8x4x32xf32> to vector<8x4xf32>
    %5 = vector.shape_cast %4 : vector<8x4xf32> to vector<8x4x1xf32>
    %6 = arith.subf %5, %3 : vector<8x4x1xf32>
    %7 = tpu.reciprocal %6 : vector<8x4x1xf32> -> vector<8x4x1xf32>
    %8 = vector.broadcast %3 : vector<8x4x1xf32> to vector<8x4x32xf32>
    %9 = arith.subf %1, %8 : vector<8x4x32xf32>
    %10 = vector.broadcast %7 : vector<8x4x1xf32> to vector<8x4x32xf32>
    %11 = arith.mulf %9, %10 : vector<8x4x32xf32>
    %12 = vector.shape_cast %11 : vector<8x4x32xf32> to vector<8x128xf32>
    %c0_2 = arith.constant 0 : index
    %c0_3 = arith.constant 0 : index
    %13 = vector.load %arg2[%c0_2, %c0_3] : memref<8x128xf32, #tpu.memory_space<vmem>>, vector<8x128xf32>
    tpu.vector_store %arg2[%c0_2, %c0_3], %12 {strides = array<i32>} : memref<8x128xf32, #tpu.memory_space<vmem>>, vector<8x128xf32>,
    return
  }
  func.func @transform_0(%arg0: i32) -> (i32, i32) {
    %c0_i32 = arith.constant 0 : i32
    %c0_i32_0 = arith.constant 0 : i32
    return %arg0, %c0_i32 : i32, i32
  }
  func.func @transform_1(%arg0: i32) -> (i32, i32) {
    %c0_i32 = arith.constant 0 : i32
    %c0_i32_0 = arith.constant 0 : i32
    return %arg0, %c0_i32 : i32, i32
  }
}

</mosaic_0001>

<bundles_post_ra>
// kernel: tpu_custom_call.1
= control target key start
LH: loop header
LB: loop body
LE: loop exit
PB: predicated region body
PF: predicated region fallthrough
CT: control target
= control target key end

     0   :  { %6 = vsyncpa [#allocation3], 0  ;;  %s495_s0 = inlined_call_operand.hbm [shape: f32[4,128], index: 0, kind: input, shape index: {}]   ;;  %s496_s1 = inlined_call_operand.hbm [shape: f32[4,128], index: 1, kind: output, shape index: {}]  }
   0x1   :  { %7 = vsyncpa [#allocation4], 0 }
   0x2   :  { %12 = vsyncadd [#allocation3], 64  ;;  %s360_s6 = smov [#allocation2]   ;;  %s312_s10 = scalar_lea.hbm %s495_s0, 64 }
   0x3   :  { %s13_s7 = sshll.u32 %s360_s6, 4  ;;  %p313_p0 = scmp.ne.s32.totalorder %s495_s0, %s312_s10  ;;  %s14_s7 = int_to_ptr.vmem [resolvable:$true] %s13_s7 }
   0x4   :  { %p316_p1 = scmp.lt.u32.totalorder %s312_s10, %s495_s0 }
   0x6   :  { %p318_p2 = pnand %p316_p1, %p313_p0 }
   0x8   :  { %321 = shalt.err (!%p318_p2)
}
   0x9   :  { %s322_s15 = scalar_lea.vmem %s14_s7, 64  ;;  %s326_s16 = scalar_lea.vmem %s14_s7, 128 }
   0xa   :  { %p323_p3 = scmp.ne.s32.totalorder %s14_s7, %s322_s15  ;;  %p327_p4 = scmp.lt.s32.totalorder %s14_s7, %s14_s7 }
   0xb   :  { %p328_p5 = scmp.lt.s32.totalorder %s326_s16, %s322_s15 }
   0xd   :  { %p329_p6 = por %p328_p5, %p327_p4 }
   0xf   :  { %p330_p7 = pnand %p329_p6, %p323_p3 }
  0x11   :  { %333 = shalt.err (!%p330_p7)
}
  0x12   :  { %s361_s17 = smov 64   ;;  %s362_s18 = smov 4  }
  0x13   :  { %19 = dma.hbm_to_vmem [thread:$0]  %s495_s0, 64, %s14_s7, [#allocation3], %s361_s17, %s361_s17, %s362_s18  }
  0x14   :  { %356 = dma.done.wait [#allocation3], 128  }
  0x15   :  { %357 = vsyncadd [#allocation3], 4294967168  ;;  %v23_v0 = vld [vmem:[#allocation2] sm:$0xff]  ;;  %s363_s21 = smov 32   ;;  %s364_s22 = smov 96   ;;  %v39_v3 = vlaneseq  ;;  %vm102_vm0 = vcmask 257024  }
  0x16   :  { %31 = vrot.lane.b32.xlu1 %v23_v0, %s363_s21  ;;  %25 = vrot.lane.b32.xlu0 %v23_v0, %s364_s22  ;;  %v365_v1 = vmov 1983009808   ;;  %v366_v4 = vmov 1934713408   ;;  %v367_v31 = vmov 0.0   ;;  %vm263_vm1 = vcmask 261120  }
  0x17   :  { %v37_v2 = vunpack.c.l.s4 %v365_v1  ;;  %v69_v5 = vunpack.c.l.s4 %v366_v4  ;;  %v40_v7 = vshrl.u32 %v39_v3, 7  ;;  %vm265_vm2 = vcmask 523264  }
  0x18   :  { %vm267_vm3 = vcmask 785408  }
  0x19   :  { %v38_v6 = vunpack.c.0.s8 %v37_v2  ;;  %v70_v10 = vunpack.c.0.s8 %v69_v5 }
  0x1a   :  { %28 = vrot.lane.b32.xlu0 %v23_v0, %s361_s17 }
  0x1b   :  { %v397_v11 = vsub.s32 %v38_v6, %v40_v7  ;;  %v399_v17 = vsub.s32 %v70_v10, %v40_v7 }
  0x88   :  { %v32_v8 = vpop.permute.xlu1 %31  ;;  %v26_v9 = vpop.permute.xlu0 %25 }
  0x89   :  { %v50_v12 = vcombine.low %v26_v9, %v32_v8  ;;  %v51_v13 = vcombine.high %v26_v9, %v32_v8 }
  0x8b   :  { %v58_v18 = vrot.slane %v50_v12, %v397_v11  ;;  %v65_v19 = vrot.slane %v51_v13, %v397_v11 }
  0x8c   :  { %v29_v14 = vpop.permute.xlu0 %28 }
  0x8d   :  { %v34_v15 = vcombine.low %v23_v0, %v29_v14  ;;  %v35_v16 = vcombine.high %v23_v0, %v29_v14 }
  0x8f   :  { %v42_v20 = vrot.slane %v34_v15, %v397_v11  ;;  %v49_v21 = vrot.slane %v35_v16, %v397_v11 }
  0x91   :  { %v66_v22 = vcombine.low %v42_v20, %v58_v18  ;;  %v67_v23 = vcombine.high %v42_v20, %v58_v18  ;;  %v82_v24 = vcombine.low %v49_v21, %v65_v19  ;;  %v83_v27 = vcombine.high %v49_v21, %v65_v19 }
  0x93   :  { %v406_v25 = vrot.slane %v66_v22, %v399_v17  ;;  %v409_v26 = vrot.slane %v67_v23, %v399_v17  ;;  %v412_v28 = vrot.slane %v82_v24, %v399_v17  ;;  %v422_v33 = vrot.slane %v83_v27, %v399_v17 }
  0x95   :  { %v109_v29 = vsel %vm102_vm0, %v409_v26, inf  ;;  %v103_v30 = vsel %vm102_vm0, %v406_v25, inf  ;;  %v419_v32 = vcombine.high %v409_v26, %v367_v31  ;;  %v115_v34 = vsel %vm102_vm0, %v412_v28, inf }
  0x96   :  { %110 = vmin.xlane.f32.xlu0 %v109_v29  ;;  %104 = vmin.xlane.f32.xlu1 %v103_v30  ;;  %v429_v36 = vcombine.high %v412_v28, %v367_v31  ;;  %v121_v37 = vsel %vm102_vm0, %v422_v33, inf  ;;  %v436_v39 = vcombine.high %v422_v33, %v367_v31  ;;  %v127_v40 = vsel %vm102_vm0, %v406_v25, -inf }
  0x97   :  { %v112_v35 = vsel %vm102_vm0, %v419_v32, inf  ;;  %v443_v42 = vcombine.high %v406_v25, %v367_v31  ;;  %v133_v43 = vsel %vm102_vm0, %v409_v26, -inf  ;;  %v139_v45 = vsel %vm102_vm0, %v412_v28, -inf }
  0x98   :  { %v118_v38 = vsel %vm102_vm0, %v429_v36, inf  ;;  %v124_v41 = vsel %vm102_vm0, %v436_v39, inf  ;;  %v136_v46 = vsel %vm102_vm0, %v419_v32, -inf  ;;  %v142_v47 = vsel %vm102_vm0, %v429_v36, -inf }
  0x99   :  { %v130_v44 = vsel %vm102_vm0, %v443_v42, -inf  ;;  %v106_v48 = vsel %vm102_vm0, %v443_v42, inf  ;;  %v148_v49 = vsel %vm102_vm0, %v436_v39, -inf  ;;  %v145_v50 = vsel %vm102_vm0, %v422_v33, -inf }
  0x9a   :  { %116 = vmin.xlane.f32.xlu0 %v115_v34  ;;  %113 = vmin.xlane.f32.xlu1 %v112_v35 }
  0x9e   :  { %122 = vmin.xlane.f32.xlu0 %v121_v37  ;;  %119 = vmin.xlane.f32.xlu1 %v118_v38 }
  0xa2   :  { %128 = vmax.xlane.f32.xlu0 %v127_v40  ;;  %125 = vmin.xlane.f32.xlu1 %v124_v41 }
  0xa6   :  { %134 = vmax.xlane.f32.xlu0 %v133_v43  ;;  %131 = vmax.xlane.f32.xlu1 %v130_v44 }
  0xaa   :  { %140 = vmax.xlane.f32.xlu0 %v139_v45  ;;  %137 = vmax.xlane.f32.xlu1 %v136_v46 }
  0xae   :  { %143 = vmax.xlane.f32.xlu1 %v142_v47  ;;  %107 = vmin.xlane.f32.xlu0 %v106_v48 }
  0xb2   :  { %149 = vmax.xlane.f32.xlu1 %v148_v49  ;;  %146 = vmax.xlane.f32.xlu0 %v145_v50 }
 0x123   :  { %v111_v51 = vpop.xlane.xlu0 %110  ;;  %v105_v52 = vpop.xlane.xlu1 %104 }
 0x124   :  { %v169_v14 = vsub.f32 %v409_v26, %v111_v51  ;;  %v167_v16 = vsub.f32 %v406_v25, %v105_v52 }
 0x127   :  { %v117_v53 = vpop.xlane.xlu0 %116  ;;  %v114_v54 = vpop.xlane.xlu1 %113 }
 0x128   :  { %v170_v18 = vsub.f32 %v419_v32, %v114_v54  ;;  %v171_v26 = vsub.f32 %v412_v28, %v117_v53 }
 0x12b   :  { %v123_v55 = vpop.xlane.xlu0 %122  ;;  %v120_v56 = vpop.xlane.xlu1 %119 }
 0x12c   :  { %v172_v30 = vsub.f32 %v429_v36, %v120_v56  ;;  %v173_v25 = vsub.f32 %v422_v33, %v123_v55 }
 0x12f   :  { %v129_v57 = vpop.xlane.xlu0 %128  ;;  %v126_v58 = vpop.xlane.xlu1 %125 }
 0x130   :  { %v151_v0 = vsub.f32 %v129_v57, %v105_v52  ;;  %v174_v31 = vsub.f32 %v436_v39, %v126_v58 }
 0x133   :  { %v135_v59 = vpop.xlane.xlu0 %134  ;;  %v132_v60 = vpop.xlane.xlu1 %131 }
 0x134   :  { %v153_v61 = vsub.f32 %v135_v59, %v111_v51 }
 0x136   :  { %296 = vrcp.f32 %v153_v61 }
 0x137   :  { %v141_v62 = vpop.xlane.xlu0 %140  ;;  %v138_v63 = vpop.xlane.xlu1 %137  ;;  %298 = vrcp.f32 %v151_v0 }
 0x138   :  { %v154_v1 = vsub.f32 %v138_v63, %v114_v54  ;;  %v155_v6 = vsub.f32 %v141_v62, %v117_v53 }
 0x13a   :  { %300 = vrcp.f32 %v154_v1 }
 0x13b   :  { %v144_v2 = vpop.xlane.xlu1 %143  ;;  %v108_v3 = vpop.xlane.xlu0 %107 }
 0x13c   :  { %v156_v4 = vsub.f32 %v144_v2, %v120_v56  ;;  %v152_v5 = vsub.f32 %v132_v60, %v108_v3  ;;  %v168_v19 = vsub.f32 %v443_v42, %v108_v3 }
 0x13e   :  { %302 = vrcp.f32 %v152_v5 }
 0x13f   :  { %v150_v7 = vpop.xlane.xlu1 %149  ;;  %v147_v8 = vpop.xlane.xlu0 %146  ;;  %304 = vrcp.f32 %v156_v4 }
 0x140   :  { %v158_v9 = vsub.f32 %v150_v7, %v126_v58  ;;  %v157_v10 = vsub.f32 %v147_v8, %v123_v55  ;;  %306 = vrcp.f32 %v155_v6  ;;  %v297_v12 = vpop.eup %296 }
 0x141   :  { %v299_v13 = vpop.eup %298  ;;  %v177_v20 = vmul.f32 %v297_v12, %v169_v14 }
 0x142   :  { %308 = vrcp.f32 %v158_v9  ;;  %v175_v27 = vmul.f32 %v299_v13, %v167_v16 }
 0x143   :  { %310 = vrcp.f32 %v157_v10 }
 0x144   :  { %v301_v15 = vpop.eup %300  ;;  %v183_v32 = vcombine.low %v175_v27, %v177_v20 }
 0x145   :  { %v178_v23 = vmul.f32 %v301_v15, %v170_v18 }
 0x146   :  { %v190_v45 = vrot.slane %v183_v32, %v397_v11 }
 0x148   :  { %v303_v21 = vpop.eup %302 }
 0x149   :  { %v305_v22 = vpop.eup %304  ;;  %v176_v24 = vmul.f32 %v303_v21, %v168_v19 }
 0x14a   :  { %v307_v29 = vpop.eup %306  ;;  %v180_v38 = vmul.f32 %v305_v22, %v172_v30 }
 0x14b   :  { %v191_v35 = vcombine.low %v176_v24, %v178_v23  ;;  %v179_v41 = vmul.f32 %v307_v29, %v171_v26 }
 0x14c   :  { %v309_v34 = vpop.eup %308 }
 0x14d   :  { %v311_v37 = vpop.eup %310  ;;  %v182_v40 = vmul.f32 %v309_v34, %v174_v31  ;;  %v198_v43 = vrot.slane %v191_v35, %v397_v11 }
 0x14e   :  { %v181_v42 = vmul.f32 %v311_v37, %v173_v25 }
 0x14f   :  { %v207_v44 = vcombine.low %v180_v38, %v182_v40  ;;  %v216_v28 = vcombine.high %v190_v45, %v198_v43  ;;  %v215_v47 = vcombine.low %v190_v45, %v198_v43 }
 0x150   :  { %v199_v36 = vcombine.low %v179_v41, %v181_v42 }
 0x151   :  { %v214_v39 = vrot.slane %v207_v44, %v397_v11  ;;  %v230_v49 = vrot.slane %v216_v28, %v399_v17  ;;  %v223_v51 = vrot.slane %v215_v47, %v399_v17 }
 0x152   :  { %v206_v46 = vrot.slane %v199_v36, %v397_v11 }
 0x154   :  { %v232_v33 = vcombine.high %v206_v46, %v214_v39  ;;  %v231_v48 = vcombine.low %v206_v46, %v214_v39 }
 0x156   :  { %v246_v50 = vrot.slane %v232_v33, %v399_v17  ;;  %v239_v52 = vrot.slane %v231_v48, %v399_v17 }
 0x158   :  { %v249_v53 = vcombine.low %v230_v49, %v246_v50  ;;  %v248_v54 = vcombine.high %v223_v51, %v239_v52  ;;  %v247_v55 = vcombine.low %v223_v51, %v239_v52  ;;  %v250_v11 = vcombine.high %v230_v49, %v246_v50 }
 0x15a   :  { %256 = vrot.lane.b32.xlu1 %v249_v53, %s361_s17  ;;  %252 = vrot.lane.b32.xlu0 %v248_v54, %s363_s21 }
 0x15e   :  { %260 = vrot.lane.b32.xlu1 %v250_v11, %s364_s22 }
 0x1cc   :  { %v257_v56 = vpop.permute.xlu1 %256  ;;  %v253_v57 = vpop.permute.xlu0 %252 }
 0x1cd   :  { %v264_v58 = vsel %vm263_vm1, %v247_v55, %v253_v57 }
 0x1ce   :  { %v266_v60 = vsel %vm265_vm2, %v264_v58, %v257_v56 }
 0x1d0   :  { %v261_v59 = vpop.permute.xlu1 %260 }
 0x1d1   :  { %v268_v61 = vsel %vm267_vm3, %v266_v60, %v261_v59 }
 0x1d2   :  { %269 = vst [vmem:[#allocation5] sm:$0xff] %v268_v61 }
 0x1d3   :  { %274 = vsyncadd [#allocation4], 64  ;;  %s368_s0 = smov [#allocation5]  }
 0x1d4   :  { %s275_s23 = sshll.u32 %s368_s0, 4  ;;  %s276_s23 = int_to_ptr.vmem [resolvable:$true] %s275_s23 }
 0x1d5   :  { %s334_s24 = scalar_lea.vmem %s276_s23, 64  ;;  %s338_s25 = scalar_lea.vmem %s276_s23, 128 }
 0x1d6   :  { %p335_p8 = scmp.ne.s32.totalorder %s276_s23, %s334_s24  ;;  %p339_p9 = scmp.lt.s32.totalorder %s276_s23, %s276_s23 }
 0x1d7   :  { %p340_p10 = scmp.lt.s32.totalorder %s338_s25, %s334_s24 }
 0x1d9   :  { %p341_p11 = por %p340_p10, %p339_p9 }
 0x1db   :  { %p342_p12 = pnand %p341_p11, %p335_p8 }
 0x1dd   :  { %345 = shalt.err (!%p342_p12)
}
 0x1de   :  { %s346_s28 = scalar_lea.hbm %s496_s1, 64 }
 0x1df   :  { %p347_p13 = scmp.ne.s32.totalorder %s496_s1, %s346_s28  ;;  %p350_p0 = scmp.lt.u32.totalorder %s346_s28, %s496_s1 }
 0x1e1   :  { %p352_p1 = pnand %p350_p0, %p347_p13 }
 0x1e3   :  { %355 = shalt.err (!%p352_p1)
}
 0x1e4   :  { %281 = dma.vmem_to_hbm [thread:$0]  %s276_s23, 64, %s496_s1, [#allocation4], %s361_s17, %s361_s17, %s362_s18  }
 0x1e5   :  { %358 = dma.done.wait [#allocation4], 128  }
 0x1e6   :  { %359 = vsyncadd [#allocation4], 4294967168 }
 0x1e7   :  { %285 = vsyncpa [#allocation3], 1 }
 0x1e8   :  { %286 = vsyncpa [#allocation4], 1 }

</bundles_post_ra>
